<compile_context>
chip_gen: v6e
topology: v6e:2x2x1
jax: 0.10.0
libtpu: 0.0.40
codegen_flags: <defaults>
</compile_context>

<pallas_src>
from functools import partial
import math

import jax
import jax.numpy as jnp
from jax import lax
from jax.experimental import pallas as pl
from jax.experimental.pallas import tpu as pltpu

NUM_BINS = 2048          # module default num_bins
N_HI = 32                # bin = hi * N_LO + lo
N_LO = 64
LO_BITS = 6
assert N_HI * N_LO == NUM_BINS and (1 << LO_BITS) == N_LO

WIDE = 512               # lane width of the slab == MXU contraction length / dot
ABS_BLK_ROWS = 2048      # 2048*512*4B = 4 MiB per abs-max block
HIST_BLK_ROWS = 512      # 512*512*4B  = 1 MiB per histogram block
NCORES = 2               # leading "parallel" grid axis (both TCs on v7x)


def _cdiv(a, b):
    return (a + b - 1) // b


def _abs_max_kernel(x_ref, max_ref, *, rows_w, blk, bpc, ncores, ch):
    """Per-lane running max of |x| into a resident (1, 1, WIDE) accumulator."""
    c = pl.program_id(0)
    i = pl.program_id(1)

    @pl.when(i == 0)
    def _init():
        max_ref[...] = jnp.zeros_like(max_ref)   # |x| >= 0, so 0 is identity

    need_mask = (ncores * bpc * blk) != rows_w
    blk_row0 = (c * bpc + i) * blk               # un-clamped absolute row base

    def body(s, m):
        r0 = pl.multiple_of(s * ch, ch)
        xa = jnp.abs(x_ref[pl.ds(r0, ch), :])
        if need_mask:
            row_id = blk_row0 + r0 + lax.broadcasted_iota(jnp.int32, xa.shape, 0)
            xa = jnp.where(row_id < rows_w, xa, jnp.zeros((), xa.dtype))
        return jnp.maximum(
            m, jnp.max(xa, axis=0, keepdims=True).astype(jnp.float32))

    m = lax.fori_loop(0, blk // ch, body, jnp.zeros((1, WIDE), jnp.float32))
    max_ref[...] = jnp.maximum(max_ref[...], m.reshape(max_ref.shape))


def _hist_kernel(scale_ref, x_ref, hist_ref, *, rows_w, blk, bpc, ncores, rpc):
    """histc(|x|, bins=2048, min=0, max=x_max), accumulated as (32, 64)."""
    c = pl.program_id(0)
    i = pl.program_id(1)

    @pl.when(i == 0)
    def _init():
        hist_ref[...] = jnp.zeros_like(hist_ref)

    scale = scale_ref[0]                         # num_bins / x_max (prefetched)

    hi_iota = lax.broadcasted_iota(jnp.int32, (N_HI, WIDE), 0)
    lo_iota = lax.broadcasted_iota(jnp.int32, (N_LO, WIDE), 0)

    need_mask = (ncores * bpc * blk) != rows_w
    blk_row0 = (c * bpc + i) * blk
    n_chunks = blk // rpc

    def chunk_body(ch, carry):
        acc0, acc1 = carry
        r0 = pl.multiple_of(ch * rpc, rpc)
        xb = x_ref[pl.ds(r0, rpc), :]                           # (rpc, 512)
        xt = jnp.abs(xb.astype(jnp.float32))
        # truncating int cast == floor for non-negative values; x == x_max
        # lands in bin NUM_BINS and is clamped to the last bin (histc behavior)
        idx = jnp.minimum((xt * scale).astype(jnp.int32), NUM_BINS - 1)
        hi = idx >> LO_BITS
        lo = idx & (N_LO - 1)
        if need_mask:
            row_id = blk_row0 + r0 + lax.broadcasted_iota(
                jnp.int32, (rpc, WIDE), 0)
            hi = jnp.where(row_id < rows_w, hi, -1)   # -1 matches no hi bin
        for r in range(rpc):                          # unrolled
            a = (hi[r:r + 1, :] == hi_iota).astype(jnp.bfloat16)   # (32, 512)
            b = (lo[r:r + 1, :] == lo_iota).astype(jnp.bfloat16)   # (64, 512)
            # outer product over (hi, lo) bins contracting K=512 on the MXU
            d = lax.dot_general(a, b, (((1,), (1,)), ((), ())),
                                preferred_element_type=jnp.float32)
            if r % 2 == 0:
                acc0 = acc0 + d
            else:
                acc1 = acc1 + d
        return acc0, acc1

    zero = jnp.zeros((N_HI, N_LO), jnp.float32)
    acc0, acc1 = lax.fori_loop(0, n_chunks, chunk_body, (zero, zero))
    hist_ref[...] += (acc0 + acc1).reshape(hist_ref.shape)


def calib_observer_forward(x):
    """CalibObserver(num_bits=8, axis=None, unsigned=False).forward(x) on a
    fresh observer.  Returns (x, calib_hist, calib_bin_edges, x_max).
    """
    # TODO(synk): skip_zeros filtering, the stateful re-binning branch of
    # collect() on later calls, and compute_amax (entropy / percentile with
    # host-side python loops + Counter) are not part of a single forward pass
    # and are not implemented here.
    numel = int(x.size)
    if numel == 0:
        raise ValueError("CalibObserver.forward: empty input tensor")

    flat = jnp.ravel(x)                                  # row-major view
    dt = flat.dtype
    if (jnp.dtype(dt).itemsize > 4
            or not (jnp.issubdtype(dt, jnp.floating)
                    or jnp.issubdtype(dt, jnp.integer))):
        flat = flat.astype(jnp.float32)
    itemsize = jnp.dtype(flat.dtype).itemsize
    rpc = 8 * max(1, 4 // itemsize)                      # rows per chunk (packing)

    pad = (-numel) % (rpc * WIDE)
    if pad:
        flat = jnp.pad(flat, (0, pad))                   # zeros -> bin 0, removed
    rows_w = (numel + pad) // WIDE
    x2d = flat.reshape(rows_w, WIDE)                     # lane-dense slab

    # ---- kernel 1: per-lane running max of |x| ----
    blk_a = min(ABS_BLK_ROWS, rows_w)
    n_blk_a = _cdiv(rows_w, blk_a)
    nc_a = min(NCORES, n_blk_a)
    bpc_a = _cdiv(n_blk_a, nc_a)
    ch_a = math.gcd(blk_a, 256)                          # divides blk_a, >= packing
    lane_max = pl.pallas_call(
        partial(_abs_max_kernel, rows_w=rows_w, blk=blk_a, bpc=bpc_a,
                ncores=nc_a, ch=ch_a),
        out_shape=jax.ShapeDtypeStruct((nc_a, 1, WIDE), jnp.float32),
        grid=(nc_a, bpc_a),
        in_specs=[pl.BlockSpec(
            (blk_a, WIDE),
            lambda c, i: (jnp.minimum(c * bpc_a + i, n_blk_a - 1), 0))],
        out_specs=pl.BlockSpec((1, 1, WIDE), lambda c, i: (c, 0, 0)),
        compiler_params=pltpu.CompilerParams(
            dimension_semantics=("parallel", "arbitrary")),
    )(x2d)
    x_max = jnp.max(lane_max)

    # ---- kernel 2: 2048-bin histogram of |x| over [0, x_max] ----
    # TODO(synk): torch.histc re-derives the range when min == max == 0; an
    # all-zero input simply lands everything in bin 0 here (module only warns).
    safe_max = jnp.where(x_max > 0.0, x_max, jnp.float32(1.0))
    scale = (jnp.float32(NUM_BINS) / safe_max).reshape(1).astype(jnp.float32)

    blk_h = min(HIST_BLK_ROWS, rows_w)
    n_blk_h = _cdiv(rows_w, blk_h)
    nc_h = min(NCORES, n_blk_h)
    bpc_h = _cdiv(n_blk_h, nc_h)
    hist_parts = pl.pallas_call(
        partial(_hist_kernel, rows_w=rows_w, blk=blk_h, bpc=bpc_h,
                ncores=nc_h, rpc=rpc),
        out_shape=jax.ShapeDtypeStruct((nc_h, N_HI, N_LO), jnp.float32),
        grid_spec=pltpu.PrefetchScalarGridSpec(
            num_scalar_prefetch=1,                       # scale lives in SMEM
            grid=(nc_h, bpc_h),
            in_specs=[pl.BlockSpec(
                (blk_h, WIDE),
                lambda c, i, s: (jnp.minimum(c * bpc_h + i, n_blk_h - 1), 0))],
            out_specs=pl.BlockSpec((1, N_HI, N_LO), lambda c, i, s: (c, 0, 0)),
        ),
        compiler_params=pltpu.CompilerParams(
            dimension_semantics=("parallel", "arbitrary")),
    )(scale, x2d)

    calib_hist = jnp.sum(hist_parts, axis=0).reshape(NUM_BINS)
    if pad:
        calib_hist = calib_hist.at[0].add(-jnp.float32(pad))  # remove pad zeros
    calib_bin_edges = jnp.linspace(0.0, x_max, NUM_BINS + 1, dtype=jnp.float32)
    return x, calib_hist, calib_bin_edges, x_max


def _reference(x):
    xa = jnp.abs(x).astype(jnp.float32).ravel()
    ref_max = jnp.max(xa)
    ref_scale = jnp.float32(NUM_BINS) / jnp.where(ref_max > 0, ref_max, 1.0)
    ref_idx = jnp.minimum((xa * ref_scale).astype(jnp.int32), NUM_BINS - 1)
    ref_hist = jnp.zeros(NUM_BINS, jnp.float32).at[ref_idx].add(1.0)
    return ref_hist, ref_max


if __name__ == "__main__":
    key = jax.random.PRNGKey(0)
    k1, k2 = jax.random.split(key)

    # small observer-like activation tensor
    x = jax.random.normal(k1, (2, 4, 16, 16), dtype=jnp.float32)
    out_x, hist, edges, amax = calib_observer_forward(x)
    jax.block_until_ready((out_x, hist, edges, amax))

    ref_hist, ref_max = _reference(x)
    assert out_x.shape == x.shape and out_x.dtype == x.dtype
    assert float(jnp.abs(amax - ref_max)) < 1e-6
    assert float(jnp.sum(hist)) == x.size
    # allow a couple of boundary elements to shift by one bin (fp rounding)
    assert float(jnp.sum(jnp.abs(hist - ref_hist))) <= 4.0
    assert float(edges[0]) == 0.0 and abs(float(edges[-1] - ref_max)) < 1e-5
    assert edges.shape == (NUM_BINS + 1,)

    # a second, ragged shape exercises multi-block / multi-core / masked paths
    x2 = 3.0 * jax.random.normal(k2, (2, 3, 217, 217), dtype=jnp.float32)
    _, hist2, edges2, amax2 = calib_observer_forward(x2)
    jax.block_until_ready((hist2, edges2, amax2))

    ref_hist2, ref_max2 = _reference(x2)
    assert float(jnp.abs(amax2 - ref_max2)) < 1e-5
    assert float(jnp.sum(hist2)) == x2.size
    assert float(jnp.sum(jnp.abs(hist2 - ref_hist2))) <= 8.0
    assert float(edges2[0]) == 0.0

    print("KERNEL_OK")
</pallas_src>

<mosaic_0001>
module attributes {stable_mosaic.version = 11 : i64} {
  func.func @_abs_max_kernel(%arg0: i32, %arg1: i32, %arg2: memref<8x512xf32, #tpu.memory_space<vmem>>, %arg3: memref<1x1x512xf32, #tpu.memory_space<vmem>>) attributes {dimension_semantics = [#tpu.dimension_semantics<parallel>, #tpu.dimension_semantics<arbitrary>], iteration_bounds = array<i64: 1, 1>, scalar_prefetch = 0 : i64, scratch_operands = 0 : i64, tpu.core_type = #tpu.core_type<tc>, window_params = [{transform_indices = @transform_0, window_bounds = array<i64: 8, 512>}, {transform_indices = @transform_1, window_bounds = array<i64: 1, 1, 512>}]} {
    %c0_i32 = arith.constant 0 : i32
    %0 = arith.cmpi eq, %arg1, %c0_i32 : i32
    %1 = arith.extui %0 : i1 to i32
    %c0_i32_0 = arith.constant 0 : i32
    %2 = arith.cmpi ne, %1, %c0_i32_0 : i32
    scf.if %2 {
      %cst_9 = arith.constant 0.000000e+00 : f32
      %16 = vector.broadcast %cst_9 : f32 to vector<1x1x512xf32>
      %c0_10 = arith.constant 0 : index
      %c0_11 = arith.constant 0 : index
      %c0_12 = arith.constant 0 : index
      %17 = vector.load %arg3[%c0_10, %c0_11, %c0_12] : memref<1x1x512xf32, #tpu.memory_space<vmem>>, vector<1x1x512xf32>
      tpu.vector_store %arg3[%c0_10, %c0_11, %c0_12], %16 {strides = array<i32>} : memref<1x1x512xf32, #tpu.memory_space<vmem>>, vector<1x1x512xf32>,
    } else {
    }
    %cst = arith.constant 0.000000e+00 : f32
    %3 = vector.broadcast %cst : f32 to vector<1x512xf32>
    %c0_i32_1 = arith.constant 0 : i32
    %c8_i32 = arith.constant 8 : i32
    %4 = arith.muli %c0_i32_1, %c8_i32 : i32
    %5 = tpu.assume_multiple %4, 8 : i32
    %6 = arith.index_cast %5 : i32 to index
    %c0 = arith.constant 0 : index
    %7 = vector.load %arg2[%6, %c0] : memref<8x512xf32, #tpu.memory_space<vmem>>, vector<8x512xf32>
    %8 = math.absf %7 : vector<8x512xf32>
    %cst_2 = arith.constant dense<0xFF800000> : vector<512xf32>
    %9 = vector.multi_reduction <maximumf>, %8, %cst_2 [0] : vector<8x512xf32> to vector<512xf32>
    %10 = vector.shape_cast %9 : vector<512xf32> to vector<1x512xf32>
    %11 = arith.maximumf %3, %10 : vector<1x512xf32>
    %c1_i32 = arith.constant 1 : i32
    %c0_3 = arith.constant 0 : index
    %c0_4 = arith.constant 0 : index
    %c0_5 = arith.constant 0 : index
    %12 = vector.load %arg3[%c0_3, %c0_4, %c0_5] : memref<1x1x512xf32, #tpu.memory_space<vmem>>, vector<1x1x512xf32>
    %13 = vector.shape_cast %11 : vector<1x512xf32> to vector<1x1x512xf32>
    %14 = arith.maximumf %12, %13 : vector<1x1x512xf32>
    %c0_6 = arith.constant 0 : index
    %c0_7 = arith.constant 0 : index
    %c0_8 = arith.constant 0 : index
    %15 = vector.load %arg3[%c0_6, %c0_7, %c0_8] : memref<1x1x512xf32, #tpu.memory_space<vmem>>, vector<1x1x512xf32>
    tpu.vector_store %arg3[%c0_6, %c0_7, %c0_8], %14 {strides = array<i32>} : memref<1x1x512xf32, #tpu.memory_space<vmem>>, vector<1x1x512xf32>,
    return
  }
  func.func @transform_0(%arg0: i32, %arg1: i32) -> (i32, i32) {
    %c1_i32 = arith.constant 1 : i32
    %0 = arith.muli %arg0, %c1_i32 : i32
    %1 = arith.addi %0, %arg1 : i32
    %c0_i32 = arith.constant 0 : i32
    %2 = arith.minsi %1, %c0_i32 : i32
    %c0_i32_0 = arith.constant 0 : i32
    %c0_i32_1 = arith.constant 0 : i32
    return %2, %c0_i32_0 : i32, i32
  }
  func.func @transform_1(%arg0: i32, %arg1: i32) -> (i32, i32, i32) {
    %c0_i32 = arith.constant 0 : i32
    %c0_i32_0 = arith.constant 0 : i32
    %c0_i32_1 = arith.constant 0 : i32
    return %arg0, %c0_i32, %c0_i32_0 : i32, i32, i32
  }
}

</mosaic_0001>

<bundles_post_ra>
// kernel: tpu_custom_call.1
= control target key start
LH: loop header
LB: loop body
LE: loop exit
PB: predicated region body
PF: predicated region fallthrough
CT: control target
= control target key end

     0   :  { %6 = vsyncpa [#allocation3], 0  ;;  %s207_s0 = inlined_call_operand.hbm [shape: f32[8,512], index: 0, kind: input, shape index: {}]   ;;  %s208_s1 = inlined_call_operand.hbm [shape: f32[1,1,512], index: 1, kind: output, shape index: {}]  }
   0x1   :  { %7 = vsyncpa [#allocation4], 0  ;;  %s179_s6 = smov [#allocation2]  }
   0x2   :  { %s20_s7 = sshll.u32 %s179_s6, 4  ;;  %s21_s7 = int_to_ptr.vmem [resolvable:$true] %s20_s7 }
   0x3   :  { %s143_s8 = scalar_lea.vmem %s21_s7, 512  ;;  %p148_p1 = scmp.lt.s32.totalorder %s21_s7, %s21_s7 }
   0x4   :  { %p144_p0 = scmp.ne.s32.totalorder %s21_s7, %s143_s8  ;;  %p149_p2 = scmp.lt.s32.totalorder %s143_s8, %s143_s8 }
   0x6   :  { %p150_p3 = por %p149_p2, %p148_p1 }
   0x8   :  { %p151_p4 = pnand %p150_p3, %p144_p0 }
   0xa   :  { %154 = shalt.err (!%p151_p4)
}
   0xb   :  { %23 = dma.hbm_to_vmem [thread:$0]  %s207_s0, 512, %s21_s7, [#allocation3]  }
   0xc   :  { %175 = dma.done.wait [#allocation3], 512  }
   0xd   :  { %176 = vsyncadd [#allocation3], 4294966784  ;;  %v34_v0 = vlaneseq  ;;  %v180_v2 = vmov 0.0   ;;  %v42_v3 = vld [vmem:[#allocation2] sm:$0xff]  ;;  %v43_v4 = vld [vmem:[#allocation2 + $0x8] sm:$0xff]  ;;  %s182_s0 = smov [#allocation5]  }
   0xe   :  { %v44_v5 = vld [vmem:[#allocation2 + $0x10] sm:$0xff]  ;;  %v45_v6 = vld [vmem:[#allocation2 + $0x18] sm:$0xff]  ;;  %v46_v7 = vand.u32 2147483647, %v42_v3  ;;  %v47_v8 = vand.u32 2147483647, %v43_v4 }
   0xf   :  { %vm196_vm0 = vcmp.lt.s32.totalorder %v34_v0, 512  ;;  %v48_v9 = vand.u32 2147483647, %v44_v5  ;;  %v49_v10 = vand.u32 2147483647, %v45_v6  ;;  %v89_v32 = vshrl.u32 %v34_v0, 7 }
  0x10   :  { %38 = vst.msk [vmem:[#allocation5] sm:$0xf] %vm196_vm0, %v180_v2  ;;  %v50_v11 = vrot.slane %v46_v7, 4  ;;  %v56_v12 = vrot.slane %v47_v8, 4  ;;  %v181_v21 = vmov 1966171168  }
  0x11   :  { %v62_v13 = vrot.slane %v48_v9, 4  ;;  %v68_v14 = vrot.slane %v49_v10, 4  ;;  %v86_v22 = vunpack.c.l.s4 %v181_v21  ;;  %s120_s11 = sshll.u32 %s182_s0, 4  ;;  %s121_s11 = int_to_ptr.vmem [resolvable:$true] %s120_s11 }
  0x12   :  { %v51_v15 = vmax.f32 %v46_v7, %v50_v11  ;;  %v57_v16 = vmax.f32 %v47_v8, %v56_v12  ;;  %s155_s12 = scalar_lea.vmem %s121_s11, 64  ;;  %p160_p6 = scmp.lt.s32.totalorder %s121_s11, %s121_s11 }
  0x13   :  { %v63_v17 = vmax.f32 %v48_v9, %v62_v13  ;;  %v69_v18 = vmax.f32 %v49_v10, %v68_v14  ;;  %v87_v31 = vunpack.c.0.s8 %v86_v22  ;;  %p156_p5 = scmp.ne.s32.totalorder %s121_s11, %s155_s12  ;;  %p161_p7 = scmp.lt.s32.totalorder %s155_s12, %s155_s12 }
  0x14   :  { %v52_v19 = vrot.slane %v51_v15, 2  ;;  %v58_v20 = vrot.slane %v57_v16, 2 }
  0x15   :  { %v64_v23 = vrot.slane %v63_v17, 2  ;;  %v70_v24 = vrot.slane %v69_v18, 2  ;;  %v90_v41 = vsub.s32 %v87_v31, %v89_v32  ;;  %p162_p8 = por %p161_p7, %p160_p6 }
  0x16   :  { %v53_v25 = vmax.f32 %v51_v15, %v52_v19  ;;  %v59_v26 = vmax.f32 %v57_v16, %v58_v20 }
  0x17   :  { %v65_v27 = vmax.f32 %v63_v17, %v64_v23  ;;  %v71_v28 = vmax.f32 %v69_v18, %v70_v24  ;;  %v78_v49 = vld [vmem:[#allocation5] sm:$0xf]  ;;  %p163_p9 = pnand %p162_p8, %p156_p5 }
  0x18   :  { %v54_v29 = vrot.slane %v53_v25, 1  ;;  %v60_v30 = vrot.slane %v59_v26, 1 }
  0x19   :  { %v66_v33 = vrot.slane %v65_v27, 1  ;;  %v72_v34 = vrot.slane %v71_v28, 1 }
  0x1a   :  { %v55_v35 = vmax.f32 %v53_v25, %v54_v29  ;;  %v61_v36 = vmax.f32 %v59_v26, %v60_v30 }
  0x1b   :  { %v67_v37 = vmax.f32 %v65_v27, %v66_v33  ;;  %v73_v38 = vmax.f32 %v71_v28, %v72_v34 }
  0x1c   :  { %v74_v39 = vmax.f32 %v55_v35, 0.0  ;;  %v75_v40 = vmax.f32 %v61_v36, 0.0 }
  0x1d   :  { %v76_v42 = vmax.f32 %v67_v37, 0.0  ;;  %v77_v43 = vmax.f32 %v73_v38, 0.0 }
  0x1e   :  { %v83_v44 = vcombine.low %v74_v39, %v75_v40 }
  0x1f   :  { %v84_v45 = vcombine.low %v76_v42, %v77_v43 }
  0x20   :  { %v91_v46 = vrot.slane %v83_v44, %v90_v41 }
  0x21   :  { %v98_v47 = vrot.slane %v84_v45, %v90_v41 }
  0x23   :  { %v99_v48 = vcombine.low %v91_v46, %v98_v47 }
  0x25   :  { %v106_v50 = vrot.slane %v99_v48, %v90_v41 }
  0x27   :  { %v108_v51 = vmax.f32 %v78_v49, %v106_v50 }
  0x29   :  { %113 = vst.msk [vmem:[#allocation5] sm:$0xf] %vm196_vm0, %v108_v51 }
  0x2a   :  { %166 = shalt.err (!%p163_p9)
}
  0x2b   :  { %123 = dma.vmem_to_hbm [thread:$0]  %s121_s11, 64, %s208_s1, [#allocation4]  }
  0x2c   :  { %177 = dma.done.wait [#allocation4], 64  }
  0x2d   :  { %178 = vsyncadd [#allocation4], 4294967232 }
  0x2e   :  { %127 = vsyncpa [#allocation3], 1 }
  0x2f   :  { %128 = vsyncpa [#allocation4], 1 }

</bundles_post_ra>
